<compile_context>
chip_gen: v6e
topology: v6e:2x2x1
jax: 0.10.0
libtpu: 0.0.40
codegen_flags: <defaults>
</compile_context>

<pallas_src>
import functools

import jax
import jax.numpy as jnp
from jax.experimental import pallas as pl
from jax.experimental.pallas import tpu as pltpu


def _round_up(x, m):
    return ((x + m - 1) // m) * m


def _cdiv(a, b):
    return -(-a // b)


def _device_is_v7():
    try:
        kind = jax.devices()[0].device_kind.lower()
    except Exception:
        return False
    return ("v7" in kind) or ("7x" in kind)


def _choose_tiles(B, S, H, Dv, in_itemsize, use_post):
    """Pick (block_b, block_s) from a double-buffered VMEM budget."""
    is_v7 = _device_is_v7()
    # Budget for the two big streamed inputs (proj_key + value), x2 double buffering.
    big_budget = (36 << 20) if is_v7 else (80 << 20)
    per_row = 2 * S * (H + Dv) * in_itemsize           # bytes / batch row at block_s == S

    cap = max(8, ((big_budget // per_row) // 8) * 8)
    if is_v7 and B > 8:
        # 2 TensorCores per chip: keep >= 2 steps on the "parallel" batch axis.
        cap = min(cap, max(8, _round_up(_cdiv(B, 2), 8)))
    if B <= cap:
        block_b = B            # single full-dim batch block: no padding, no ragged block
    else:
        block_b = cap          # multiple of 8; ragged last block handled by Pallas

    block_s = S
    if (not use_post) and block_b * per_row > big_budget and S % 128 == 0 and S > 128:
        # Even 8 full-S rows blow the budget -> split the sequence axis (online
        # softmax in the kernel). block_s must divide S and be a multiple of 128
        # so the stashed-score lane writes stay aligned.
        per_col = 2 * block_b * (H + Dv) * in_itemsize
        target = max(128, ((big_budget // per_col) // 128) * 128)
        block_s = 128
        for cand in range(256, S, 128):
            if S % cand == 0 and cand <= target:
                block_s = cand
    # TODO(synk): S that is not a multiple of 128 (or copy/ratings with huge S)
    # cannot be split along the sequence axis and falls back to block_s == S.
    return block_b, block_s, is_v7


def _vmem_limit_bytes(block_b, block_s, S, H, Dv, in_itemsize, n_opt, is_v7):
    big = 2 * block_b * block_s * (H + Dv) * in_itemsize        # proj_key + value (x2 buffers)
    small = 2 * (block_b * H + H) * 4                           # qp + ve
    opts = 2 * n_opt * block_b * block_s * 4                    # mask / copy / ratings
    outs = 2 * block_b * (Dv + S) * 4                           # ctx + resident full-S alphas
    scratch = block_b * (2 + Dv) * 4
    need = big + small + opts + outs + scratch + (4 << 20)      # compiler scratch margin
    cap = (60 << 20) if is_v7 else (120 << 20)
    return int(min(cap, max(32 << 20, need)))


def _bahdanau_kernel(qp_ref, k_ref, v_ref, ve_ref, *refs,
                     block_s, use_mask, use_copy, use_ratings,
                     approx_recip, tanh_dtype):
    n_opt = int(use_mask) + int(use_copy) + int(use_ratings)
    opt = list(refs[:n_opt])
    ctx_ref, alpha_ref = refs[n_opt], refs[n_opt + 1]
    m_sc, l_sc, acc_sc = refs[n_opt + 2], refs[n_opt + 3], refs[n_opt + 4]
    mask_ref = opt.pop(0) if use_mask else None
    copy_ref = opt.pop(0) if use_copy else None
    rat_ref = opt.pop(0) if use_ratings else None
    use_post = use_copy or use_ratings

    def recip(x):
        return pl.reciprocal(x, approx=approx_recip)

    # ---- additive score for this (batch, seq) tile ----
    # score[b, s] = sum_h ve[h] * tanh(qp[b, h] + proj_key[b, s, h])
    qp = qp_ref[...].astype(jnp.float32)                    # [Bb, H]
    k = k_ref[...].astype(jnp.float32)                      # [Bb, Sb, H]   (H on lanes)
    ve = ve_ref[...].astype(jnp.float32)                    # [1, H]
    x = k + qp[:, None, :]
    if tanh_dtype is not None:                               # optional bf16 EUP tanh (v6e/v7x)
        t = jnp.tanh(x.astype(tanh_dtype)).astype(jnp.float32)
    else:
        t = jnp.tanh(x)
    scores = jnp.sum(t * ve[None, :, :], axis=-1)            # [Bb, Sb]   (lane reduce)
    if use_mask:
        scores = jnp.where(mask_ref[...] == 0, -jnp.inf, scores)

    v = v_ref[...].astype(jnp.float32)                       # [Bb, Sb, Dv]

    if not use_post:
        # ---- flash-style online softmax over the (arbitrary) sequence grid axis ----
        s_idx = pl.program_id(1)
        n_s = pl.num_programs(1)

        @pl.when(s_idx == 0)
        def _():
            m_sc[...] = jnp.full_like(m_sc, -jnp.inf)
            l_sc[...] = jnp.zeros_like(l_sc)
            acc_sc[...] = jnp.zeros_like(acc_sc)

        # Stash raw (masked) scores into the resident full-S alphas output block.
        off = pl.multiple_of(s_idx * block_s, block_s)
        alpha_ref[:, pl.ds(off, block_s)] = scores.astype(alpha_ref.dtype)

        m_prev = m_sc[...]
        m_new = jnp.maximum(m_prev, jnp.max(scores, axis=-1, keepdims=True))
        if use_mask:
            # Guard rows whose every position seen so far is masked (m == -inf).
            a = jnp.where(m_new == -jnp.inf, 0.0, jnp.exp(m_prev - m_new))
            p = jnp.where(scores == -jnp.inf, 0.0, jnp.exp(scores - m_new))
        else:
            a = jnp.exp(m_prev - m_new)
            p = jnp.exp(scores - m_new)
        l_sc[...] = a * l_sc[...] + jnp.sum(p, axis=-1, keepdims=True)
        # VPU multiply + sublane reduce (an M=1 batched MXU matmul would be
        # serialized per batch row and use ~1/256 of the MXU).
        acc_sc[...] = a * acc_sc[...] + jnp.sum(p[:, :, None] * v, axis=1)
        m_sc[...] = m_new

        @pl.when(s_idx == n_s - 1)
        def _():
            inv_l = recip(l_sc[...])
            raw = alpha_ref[...].astype(jnp.float32)          # [Bb, S] raw scores
            # Fully-masked rows give -inf - (-inf) = NaN, matching PyTorch.
            alpha_ref[...] = (jnp.exp(raw - m_sc[...]) * inv_l).astype(alpha_ref.dtype)
            ctx_ref[...] = (acc_sc[...] * inv_l).astype(ctx_ref.dtype)
    else:
        # copy / ratings modify alphas AFTER the softmax, so the context needs
        # the final alphas: the wrapper keeps the whole sequence resident here
        # (block_s == S, a single sequence step).
        smax = jnp.max(scores, axis=-1, keepdims=True)
        e = jnp.exp(scores - smax)
        alphas = e * recip(jnp.sum(e, axis=-1, keepdims=True))
        if use_copy:
            alphas = alphas + copy_ref[...].astype(jnp.float32)
            l1 = jnp.sum(jnp.abs(alphas), axis=-1, keepdims=True)
            alphas = alphas * recip(jnp.maximum(l1, 1e-12))    # F.normalize(p=1, dim=-1)
        if use_ratings:
            s2 = alphas + rat_ref[...].astype(jnp.float32)
            m2 = jnp.max(s2, axis=-1, keepdims=True)
            e2 = jnp.exp(s2 - m2)
            alphas = e2 * recip(jnp.sum(e2, axis=-1, keepdims=True))
        alpha_ref[...] = alphas.astype(alpha_ref.dtype)
        # VPU multiply + sublane reduce for context (alphas kept in f32).
        ctx_ref[...] = jnp.sum(alphas[:, :, None] * v, axis=1).astype(ctx_ref.dtype)


def bahdanau_attention(query, proj_key, value, wq, ve_row,
                       mask=None, copy=None, ratings=None,
                       block_b=None, block_s=None,
                       approx_reciprocal=False, tanh_dtype=None):
    """query [B,1,Dq], proj_key [B,S,H], value [B,S,Dv],
       wq = query_layer.weight [H,Dq], ve_row = energy_layer.weight [1,H],
       mask/copy/ratings [B,S] or None.
       Returns (context [B,1,Dv], alphas [B,1,S]) exactly as the PyTorch module.
       proj_key/value may be passed in bf16 to halve HBM traffic (upcast in-kernel)."""
    B, M, Dq = query.shape
    assert M == 1, "kernel assumes a single query step per batch (M == 1)"
    _, S, H = proj_key.shape
    Dv = value.shape[-1]

    hi = jax.lax.Precision.HIGHEST
    # Hoist the query projection into one well-shaped batched XLA matmul.
    qp = jnp.einsum('bmd,hd->bmh', query, wq, precision=hi)[:, 0, :].astype(jnp.float32)

    use_mask = mask is not None
    use_copy = copy is not None
    use_ratings = ratings is not None
    use_post = use_copy or use_ratings
    n_opt = int(use_mask) + int(use_copy) + int(use_ratings)

    in_itemsize = max(jnp.dtype(proj_key.dtype).itemsize, jnp.dtype(value.dtype).itemsize)
    auto_bb, auto_bs, is_v7 = _choose_tiles(B, S, H, Dv, in_itemsize, use_post)

    if block_b is None:
        block_b = auto_bb
    block_b = int(block_b)
    if block_b >= B:
        block_b = B                            # one full-dim batch block (no padding)
    else:
        block_b = max(8, (block_b // 8) * 8)   # sublane-aligned; ragged last block OK

    if block_s is None:
        block_s = auto_bs
    block_s = int(block_s)
    if use_post or block_s <= 0 or S % block_s != 0 or (block_s != S and block_s % 128 != 0):
        block_s = S

    grid = (_cdiv(B, block_b), S // block_s)

    in_specs = [
        pl.BlockSpec((block_b, H), lambda b, s: (b, 0)),             # projected query
        pl.BlockSpec((block_b, block_s, H), lambda b, s: (b, s, 0)),  # proj_key (native layout)
        pl.BlockSpec((block_b, block_s, Dv), lambda b, s: (b, s, 0)),  # value
        pl.BlockSpec((1, H), lambda b, s: (0, 0)),                    # energy weight row
    ]
    args = [qp, proj_key, value, ve_row.astype(jnp.float32)]
    opt_spec = pl.BlockSpec((block_b, block_s), lambda b, s: (b, s))
    if use_mask:
        m32 = mask if jnp.dtype(mask.dtype).itemsize == 4 else mask.astype(jnp.int32)
        args.append(m32); in_specs.append(opt_spec)
    if use_copy:
        args.append(copy.astype(jnp.float32)); in_specs.append(opt_spec)
    if use_ratings:
        args.append(ratings.astype(jnp.float32)); in_specs.append(opt_spec)

    kernel = functools.partial(
        _bahdanau_kernel, block_s=block_s, use_mask=use_mask, use_copy=use_copy,
        use_ratings=use_ratings, approx_recip=approx_reciprocal, tanh_dtype=tanh_dtype)

    ctx2d, alphas2d = pl.pallas_call(
        kernel,
        out_shape=(jax.ShapeDtypeStruct((B, Dv), jnp.float32),
                   jax.ShapeDtypeStruct((B, S), jnp.float32)),
        grid=grid,
        in_specs=in_specs,
        out_specs=[pl.BlockSpec((block_b, Dv), lambda b, s: (b, 0)),   # context (resident over s)
                   pl.BlockSpec((block_b, S), lambda b, s: (b, 0))],   # alphas  (resident over s)
        scratch_shapes=[pltpu.VMEM((block_b, 1), jnp.float32),    # running max
                        pltpu.VMEM((block_b, 1), jnp.float32),    # running sum
                        pltpu.VMEM((block_b, Dv), jnp.float32)],  # context accumulator
        compiler_params=pltpu.CompilerParams(
            dimension_semantics=("parallel", "arbitrary"),
            vmem_limit_bytes=_vmem_limit_bytes(block_b, block_s, S, H, Dv,
                                               in_itemsize, n_opt, is_v7)),
    )(*args)

    return ctx2d.reshape(B, 1, Dv), alphas2d.reshape(B, 1, S)


def _reference(query, proj_key, value, wq, ve_row, mask, copy, ratings):
    # Pure-JAX mirror of the PyTorch forward, for correctness checking.
    hi = jax.lax.Precision.HIGHEST
    q = jnp.einsum('bmd,hd->bmh', query, wq, precision=hi)              # query_layer
    scores = jnp.einsum('bsh,oh->bso', jnp.tanh(q + proj_key), ve_row,
                        precision=hi)                                   # energy_layer
    scores = jnp.transpose(scores[..., 0:1], (0, 2, 1))                 # squeeze(2).unsqueeze(1)
    if mask is not None:
        scores = jnp.where(mask[:, None, :] == 0, -jnp.inf, scores)
    alphas = jax.nn.softmax(scores, axis=-1)
    if copy is not None:
        alphas = alphas + copy[:, None, :]
        l1 = jnp.sum(jnp.abs(alphas), axis=-1, keepdims=True)
        alphas = alphas / jnp.maximum(l1, 1e-12)
    if ratings is not None:
        alphas = jax.nn.softmax(alphas + ratings[:, None, :], axis=-1)
    context = jnp.einsum('bms,bsd->bmd', alphas, value, precision=hi)
    return context, alphas


if __name__ == "__main__":
    # ---------------- small shapes: all three optional-input paths ----------------
    B, S, Dq, H, Dv = 2, 8, 32, 32, 16

    key = jax.random.PRNGKey(0)
    ks = jax.random.split(key, 10)
    # Deterministic parameter init (shapes from nn.Linear in __init__):
    #   query_layer.weight: [hidden, query_size]; energy_layer.weight: [1, hidden]
    wq = jax.random.normal(ks[0], (H, Dq), jnp.float32) * 0.1
    ve_row = jax.random.normal(ks[1], (1, H), jnp.float32) * 0.1
    # (key_layer.weight [H, key_size] exists in __init__ but is unused in forward.)

    query = jax.random.normal(ks[2], (B, 1, Dq), jnp.float32)
    proj_key = jax.random.normal(ks[3], (B, S, H), jnp.float32)
    value = jax.random.normal(ks[4], (B, S, Dv), jnp.float32)
    mask = jnp.ones((B, S), jnp.int32).at[:, -2:].set(0)             # mask last 2 positions
    copy = jax.nn.softmax(jax.random.normal(ks[5], (B, S), jnp.float32), axis=-1)
    ratings = jax.random.uniform(ks[6], (B, S), jnp.float32)

    # Full path: mask + copy + ratings (full-S resident path).
    ctx, alphas = bahdanau_attention(query, proj_key, value, wq, ve_row,
                                     mask=mask, copy=copy, ratings=ratings)
    jax.block_until_ready((ctx, alphas))
    ctx_ref, alphas_ref = _reference(query, proj_key, value, wq, ve_row, mask, copy, ratings)
    assert ctx.shape == (B, 1, Dv) and alphas.shape == (B, 1, S)
    assert jnp.allclose(ctx, ctx_ref, atol=1e-4, rtol=1e-4)
    assert jnp.allclose(alphas, alphas_ref, atol=1e-4, rtol=1e-4)

    # Mask-only path (copy/ratings not passed -> no dummy DMAs, online-softmax path).
    ctx2, alphas2 = bahdanau_attention(query, proj_key, value, wq, ve_row, mask=mask)
    jax.block_until_ready((ctx2, alphas2))
    ctx2_ref, alphas2_ref = _reference(query, proj_key, value, wq, ve_row, mask, None, None)
    assert jnp.allclose(ctx2, ctx2_ref, atol=1e-4, rtol=1e-4)
    assert jnp.allclose(alphas2, alphas2_ref, atol=1e-4, rtol=1e-4)

    # No-optional path (pure additive attention + softmax).
    ctx3, alphas3 = bahdanau_attention(query, proj_key, value, wq, ve_row)
    jax.block_until_ready((ctx3, alphas3))
    ctx3_ref, alphas3_ref = _reference(query, proj_key, value, wq, ve_row, None, None, None)
    assert jnp.allclose(ctx3, ctx3_ref, atol=1e-4, rtol=1e-4)
    assert jnp.allclose(alphas3, alphas3_ref, atol=1e-4, rtol=1e-4)

    # ------- larger shapes: exercise ragged batch block + multi-step S grid -------
    B2, S2, H2, Dv2 = 10, 512, 128, 64
    wq2 = jax.random.normal(ks[7], (H2, H2), jnp.float32) * 0.1
    ve2 = jax.random.normal(ks[8], (1, H2), jnp.float32) * 0.1
    q2 = jax.random.normal(ks[9], (B2, 1, H2), jnp.float32)
    pk2 = jax.random.normal(ks[3], (B2, S2, H2), jnp.float32)
    v2 = jax.random.normal(ks[4], (B2, S2, Dv2), jnp.float32)
    mask2 = jnp.ones((B2, S2), jnp.int32)
    mask2 = mask2.at[:, -3:].set(0)          # mask tail positions for every row
    mask2 = mask2.at[0, :256].set(0)         # row 0: first two S blocks fully masked
    ctx4, alphas4 = bahdanau_attention(q2, pk2, v2, wq2, ve2, mask=mask2,
                                       block_b=8, block_s=128)   # grid (2, 4), ragged batch
    jax.block_until_ready((ctx4, alphas4))
    ctx4_ref, alphas4_ref = _reference(q2, pk2, v2, wq2, ve2, mask2, None, None)
    assert jnp.allclose(ctx4, ctx4_ref, atol=1e-4, rtol=1e-3)
    assert jnp.allclose(alphas4, alphas4_ref, atol=1e-4, rtol=1e-3)

    print("KERNEL_OK")
</pallas_src>

<mosaic_0001>
module attributes {stable_mosaic.version = 11 : i64} {
  func.func @_bahdanau_kernel(%arg0: i32, %arg1: i32, %arg2: memref<2x32xf32, #tpu.memory_space<vmem>>, %arg3: memref<2x8x32xf32, #tpu.memory_space<vmem>>, %arg4: memref<2x8x16xf32, #tpu.memory_space<vmem>>, %arg5: memref<1x32xf32, #tpu.memory_space<vmem>>, %arg6: memref<2x8xi32, #tpu.memory_space<vmem>>, %arg7: memref<2x8xf32, #tpu.memory_space<vmem>>, %arg8: memref<2x8xf32, #tpu.memory_space<vmem>>, %arg9: memref<2x16xf32, #tpu.memory_space<vmem>>, %arg10: memref<2x8xf32, #tpu.memory_space<vmem>>, %arg11: memref<2x1xf32, #tpu.memory_space<vmem>>, %arg12: memref<2x1xf32, #tpu.memory_space<vmem>>, %arg13: memref<2x16xf32, #tpu.memory_space<vmem>>) attributes {dimension_semantics = [#tpu.dimension_semantics<parallel>, #tpu.dimension_semantics<arbitrary>], iteration_bounds = array<i64: 1, 1>, scalar_prefetch = 0 : i64, scratch_operands = 3 : i64, tpu.core_type = #tpu.core_type<tc>, window_params = [{transform_indices = @transform_0, window_bounds = array<i64: 2, 32>}, {transform_indices = @transform_1, window_bounds = array<i64: 2, 8, 32>}, {transform_indices = @transform_2, window_bounds = array<i64: 2, 8, 16>}, {pipeline_mode = #tpu.pipeline_mode<synchronous>, transform_indices = @transform_3, window_bounds = array<i64: 1, 32>}, {transform_indices = @transform_4, window_bounds = array<i64: 2, 8>}, {transform_indices = @transform_5, window_bounds = array<i64: 2, 8>}, {transform_indices = @transform_6, window_bounds = array<i64: 2, 8>}, {transform_indices = @transform_7, window_bounds = array<i64: 2, 16>}, {transform_indices = @transform_8, window_bounds = array<i64: 2, 8>}]} {
    %c0 = arith.constant 0 : index
    %c0_0 = arith.constant 0 : index
    %0 = vector.load %arg2[%c0, %c0_0] : memref<2x32xf32, #tpu.memory_space<vmem>>, vector<2x32xf32>
    %c0_1 = arith.constant 0 : index
    %c0_2 = arith.constant 0 : index
    %c0_3 = arith.constant 0 : index
    %1 = vector.load %arg3[%c0_1, %c0_2, %c0_3] : memref<2x8x32xf32, #tpu.memory_space<vmem>>, vector<2x8x32xf32>
    %c0_4 = arith.constant 0 : index
    %c0_5 = arith.constant 0 : index
    %2 = vector.load %arg5[%c0_4, %c0_5] : memref<1x32xf32, #tpu.memory_space<vmem>>, vector<1x32xf32>
    %3 = vector.shape_cast %0 : vector<2x32xf32> to vector<2x1x32xf32>
    %4 = vector.broadcast %3 : vector<2x1x32xf32> to vector<2x8x32xf32>
    %5 = arith.addf %1, %4 : vector<2x8x32xf32>
    %6 = math.tanh %5 : vector<2x8x32xf32>
    %7 = vector.shape_cast %2 : vector<1x32xf32> to vector<1x1x32xf32>
    %8 = vector.broadcast %7 : vector<1x1x32xf32> to vector<2x8x32xf32>
    %9 = arith.mulf %6, %8 : vector<2x8x32xf32>
    %cst = arith.constant dense<0.000000e+00> : vector<2x8xf32>
    %10 = vector.multi_reduction <add>, %9, %cst [2] : vector<2x8x32xf32> to vector<2x8xf32>
    %c0_6 = arith.constant 0 : index
    %c0_7 = arith.constant 0 : index
    %11 = vector.load %arg6[%c0_6, %c0_7] : memref<2x8xi32, #tpu.memory_space<vmem>>, vector<2x8xi32>
    %c0_i32 = arith.constant 0 : i32
    %12 = vector.broadcast %c0_i32 : i32 to vector<2x8xi32>
    %13 = arith.cmpi eq, %11, %12 : vector<2x8xi32>
    %cst_8 = arith.constant 0xFF800000 : f32
    %14 = vector.broadcast %cst_8 : f32 to vector<2x8xf32>
    %15 = arith.select %13, %14, %10 : vector<2x8xi1>, vector<2x8xf32>
    %c0_9 = arith.constant 0 : index
    %c0_10 = arith.constant 0 : index
    %c0_11 = arith.constant 0 : index
    %16 = vector.load %arg4[%c0_9, %c0_10, %c0_11] : memref<2x8x16xf32, #tpu.memory_space<vmem>>, vector<2x8x16xf32>
    %cst_12 = arith.constant dense<0xFF800000> : vector<2xf32>
    %17 = vector.multi_reduction <maximumf>, %15, %cst_12 [1] : vector<2x8xf32> to vector<2xf32>
    %18 = vector.shape_cast %17 : vector<2xf32> to vector<2x1xf32>
    %19 = vector.broadcast %18 : vector<2x1xf32> to vector<2x8xf32>
    %20 = arith.subf %15, %19 : vector<2x8xf32>
    %21 = math.exp %20 : vector<2x8xf32>
    %cst_13 = arith.constant dense<0.000000e+00> : vector<2xf32>
    %22 = vector.multi_reduction <add>, %21, %cst_13 [1] : vector<2x8xf32> to vector<2xf32>
    %23 = vector.shape_cast %22 : vector<2xf32> to vector<2x1xf32>
    %24 = tpu.reciprocal %23 : vector<2x1xf32> -> vector<2x1xf32>
    %25 = vector.broadcast %24 : vector<2x1xf32> to vector<2x8xf32>
    %26 = arith.mulf %21, %25 : vector<2x8xf32>
    %c0_14 = arith.constant 0 : index
    %c0_15 = arith.constant 0 : index
    %27 = vector.load %arg7[%c0_14, %c0_15] : memref<2x8xf32, #tpu.memory_space<vmem>>, vector<2x8xf32>
    %28 = arith.addf %26, %27 : vector<2x8xf32>
    %29 = math.absf %28 : vector<2x8xf32>
    %cst_16 = arith.constant dense<0.000000e+00> : vector<2xf32>
    %30 = vector.multi_reduction <add>, %29, %cst_16 [1] : vector<2x8xf32> to vector<2xf32>
    %31 = vector.shape_cast %30 : vector<2xf32> to vector<2x1xf32>
    %cst_17 = arith.constant 9.99999996E-13 : f32
    %32 = vector.broadcast %cst_17 : f32 to vector<2x1xf32>
    %33 = arith.maximumf %31, %32 : vector<2x1xf32>
    %34 = tpu.reciprocal %33 : vector<2x1xf32> -> vector<2x1xf32>
    %35 = vector.broadcast %34 : vector<2x1xf32> to vector<2x8xf32>
    %36 = arith.mulf %28, %35 : vector<2x8xf32>
    %c0_18 = arith.constant 0 : index
    %c0_19 = arith.constant 0 : index
    %37 = vector.load %arg8[%c0_18, %c0_19] : memref<2x8xf32, #tpu.memory_space<vmem>>, vector<2x8xf32>
    %38 = arith.addf %36, %37 : vector<2x8xf32>
    %cst_20 = arith.constant dense<0xFF800000> : vector<2xf32>
    %39 = vector.multi_reduction <maximumf>, %38, %cst_20 [1] : vector<2x8xf32> to vector<2xf32>
    %40 = vector.shape_cast %39 : vector<2xf32> to vector<2x1xf32>
    %41 = vector.broadcast %40 : vector<2x1xf32> to vector<2x8xf32>
    %42 = arith.subf %38, %41 : vector<2x8xf32>
    %43 = math.exp %42 : vector<2x8xf32>
    %cst_21 = arith.constant dense<0.000000e+00> : vector<2xf32>
    %44 = vector.multi_reduction <add>, %43, %cst_21 [1] : vector<2x8xf32> to vector<2xf32>
    %45 = vector.shape_cast %44 : vector<2xf32> to vector<2x1xf32>
    %46 = tpu.reciprocal %45 : vector<2x1xf32> -> vector<2x1xf32>
    %47 = vector.broadcast %46 : vector<2x1xf32> to vector<2x8xf32>
    %48 = arith.mulf %43, %47 : vector<2x8xf32>
    %c0_22 = arith.constant 0 : index
    %c0_23 = arith.constant 0 : index
    %49 = vector.load %arg10[%c0_22, %c0_23] : memref<2x8xf32, #tpu.memory_space<vmem>>, vector<2x8xf32>
    tpu.vector_store %arg10[%c0_22, %c0_23], %48 {strides = array<i32>} : memref<2x8xf32, #tpu.memory_space<vmem>>, vector<2x8xf32>,
    %50 = vector.shape_cast %48 : vector<2x8xf32> to vector<2x8x1xf32>
    %51 = vector.broadcast %50 : vector<2x8x1xf32> to vector<2x8x16xf32>
    %52 = arith.mulf %51, %16 : vector<2x8x16xf32>
    %cst_24 = arith.constant dense<0.000000e+00> : vector<2x16xf32>
    %53 = vector.multi_reduction <add>, %52, %cst_24 [1] : vector<2x8x16xf32> to vector<2x16xf32>
    %c0_25 = arith.constant 0 : index
    %c0_26 = arith.constant 0 : index
    %54 = vector.load %arg9[%c0_25, %c0_26] : memref<2x16xf32, #tpu.memory_space<vmem>>, vector<2x16xf32>
    tpu.vector_store %arg9[%c0_25, %c0_26], %53 {strides = array<i32>} : memref<2x16xf32, #tpu.memory_space<vmem>>, vector<2x16xf32>,
    return
  }
  func.func @transform_0(%arg0: i32, %arg1: i32) -> (i32, i32) {
    %c0_i32 = arith.constant 0 : i32
    %c0_i32_0 = arith.constant 0 : i32
    return %arg0, %c0_i32 : i32, i32
  }
  func.func @transform_1(%arg0: i32, %arg1: i32) -> (i32, i32, i32) {
    %c0_i32 = arith.constant 0 : i32
    %c0_i32_0 = arith.constant 0 : i32
    return %arg0, %arg1, %c0_i32 : i32, i32, i32
  }
  func.func @transform_2(%arg0: i32, %arg1: i32) -> (i32, i32, i32) {
    %c0_i32 = arith.constant 0 : i32
    %c0_i32_0 = arith.constant 0 : i32
    return %arg0, %arg1, %c0_i32 : i32, i32, i32
  }
  func.func @transform_3(%arg0: i32, %arg1: i32) -> (i32, i32) {
    %c0_i32 = arith.constant 0 : i32
    %c0_i32_0 = arith.constant 0 : i32
    %c0_i32_1 = arith.constant 0 : i32
    return %c0_i32, %c0_i32_0 : i32, i32
  }
  func.func @transform_4(%arg0: i32, %arg1: i32) -> (i32, i32) {
    %c0_i32 = arith.constant 0 : i32
    return %arg0, %arg1 : i32, i32
  }
  func.func @transform_5(%arg0: i32, %arg1: i32) -> (i32, i32) {
    %c0_i32 = arith.constant 0 : i32
    return %arg0, %arg1 : i32, i32
  }
  func.func @transform_6(%arg0: i32, %arg1: i32) -> (i32, i32) {
    %c0_i32 = arith.constant 0 : i32
    return %arg0, %arg1 : i32, i32
  }
  func.func @transform_7(%arg0: i32, %arg1: i32) -> (i32, i32) {
    %c0_i32 = arith.constant 0 : i32
    %c0_i32_0 = arith.constant 0 : i32
    return %arg0, %c0_i32 : i32, i32
  }
  func.func @transform_8(%arg0: i32, %arg1: i32) -> (i32, i32) {
    %c0_i32 = arith.constant 0 : i32
    %c0_i32_0 = arith.constant 0 : i32
    return %arg0, %c0_i32 : i32, i32
  }
}

</mosaic_0001>

<bundles_post_ra>
// kernel: tpu_custom_call.1
= control target key start
LH: loop header
LB: loop body
LE: loop exit
PB: predicated region body
PF: predicated region fallthrough
CT: control target
= control target key end

     0   :  { %14 = vsyncpa [#allocation6], 0  ;;  %s478_s0 = inlined_call_operand.hbm [shape: f32[2,32], index: 0, kind: input, shape index: {}]   ;;  %s479_s1 = inlined_call_operand.hbm [shape: f32[2,8,32], index: 1, kind: input, shape index: {}]   ;;  %s480_s2 = inlined_call_operand.hbm [shape: f32[2,8,16], index: 2, kind: input, shape index: {}]   ;;  %s481_s3 = inlined_call_operand.vmem [shape: f32[1,32], index: 3, kind: input, shape index: {}]   ;;  %s482_s4 = inlined_call_operand.vmem [shape: s32[2,8], index: 4, kind: input, shape index: {}]   ;;  %s483_s5 = inlined_call_operand.vmem [shape: f32[2,8], index: 5, kind: input, shape index: {}]   ;;  %s484_s6 = inlined_call_operand.vmem [shape: f32[2,8], index: 6, kind: input, shape index: {}]   ;;  %s485_s7 = inlined_call_operand.hbm [shape: f32[2,16], index: 7, kind: output, shape index: {0}]   ;;  %s486_s8 = inlined_call_operand.hbm [shape: f32[2,8], index: 8, kind: output, shape index: {1}]  }
   0x1   :  { %15 = vsyncpa [#allocation9], 0 }
   0x2   :  { %16 = vsyncpa [#allocation7], 0 }
   0x3   :  { %17 = vsyncpa [#allocation13], 0  ;;  %s379_s27 = smov [#allocation8]  }
   0x4   :  { %s33_s28 = sshll.u32 %s379_s27, 4  ;;  %s34_s28 = int_to_ptr.vmem [resolvable:$true] %s33_s28 }
   0x5   :  { %s279_s29 = scalar_lea.vmem %s34_s28, 256  ;;  %p284_p1 = scmp.lt.s32.totalorder %s34_s28, %s34_s28 }
   0x6   :  { %p280_p0 = scmp.ne.s32.totalorder %s34_s28, %s279_s29  ;;  %p285_p2 = scmp.lt.s32.totalorder %s279_s29, %s279_s29 }
   0x8   :  { %p286_p3 = por %p285_p2, %p284_p1 }
   0xa   :  { %p287_p4 = pnand %p286_p3, %p280_p0 }
   0xc   :  { %290 = shalt.err (!%p287_p4)
}
   0xd   :  { %s380_s30 = smov 128   ;;  %s381_s9 = smov 8  }
   0xe   :  { %39 = dma.hbm_to_vmem [thread:$0]  %s479_s1, 256, %s34_s28, [#allocation9], %s380_s30, %s380_s30, %s381_s9  }
   0xf   :  { %s382_s12 = smov [#allocation5]   ;;  %s383_s14 = smov [#allocation10]  }
  0x10   :  { %s24_s13 = sshll.u32 %s382_s12, 4  ;;  %s45_s15 = sshll.u32 %s383_s14, 4  ;;  %s25_s13 = int_to_ptr.vmem [resolvable:$true] %s24_s13  ;;  %s46_s15 = int_to_ptr.vmem [resolvable:$true] %s45_s15 }
  0x11   :  { %s299_s16 = scalar_lea.vmem %s25_s13, 32  ;;  %p304_p6 = scmp.lt.s32.totalorder %s25_s13, %s25_s13 }
  0x12   :  { %p300_p5 = scmp.ne.s32.totalorder %s25_s13, %s299_s16  ;;  %p305_p7 = scmp.lt.s32.totalorder %s299_s16, %s299_s16 }
  0x14   :  { %p306_p8 = por %p305_p7, %p304_p6 }
  0x16   :  { %p307_p9 = pnand %p306_p8, %p300_p5 }
  0x18   :  { %310 = shalt.err (!%p307_p9)
}
  0x19   :  { %27 = dma.hbm_to_vmem [thread:$0]  %s478_s0, 32, %s25_s13, [#allocation6]  }
  0x1a   :  { %s319_s19 = scalar_lea.vmem %s46_s15, 256  ;;  %p324_p11 = scmp.lt.s32.totalorder %s46_s15, %s46_s15 }
  0x1b   :  { %p320_p10 = scmp.ne.s32.totalorder %s46_s15, %s319_s19  ;;  %p325_p12 = scmp.lt.s32.totalorder %s319_s19, %s319_s19 }
  0x1d   :  { %p326_p13 = por %p325_p12, %p324_p11 }
  0x1f   :  { %p327_p0 = pnand %p326_p13, %p320_p10 }
  0x21   :  { %330 = shalt.err (!%p327_p0)
}
  0x22   :  { %51 = dma.hbm_to_vmem [thread:$0]  %s480_s2, 256, %s46_s15, [#allocation9], %s380_s30, %s380_s30, %s381_s9  }
  0x23   :  { %371 = dma.done.wait [#allocation6], 32  }
  0x24   :  { %372 = vsyncadd [#allocation6], 4294967264 }
  0x25   :  { %373 = dma.done.wait [#allocation9], 512  }
  0x26   :  { %374 = vsyncadd [#allocation9], 4294966784  ;;  %v85_v0 = vlaneseq  ;;  %v384_v1 = vmov 1966171168   ;;  %v70_v10 = vld [vmem:[#allocation8] sm:$0xff]  ;;  %v71_v13 = vld [vmem:[#allocation8 + $0x8] sm:$0xff] }
  0x27   :  { %v83_v2 = vunpack.c.l.s4 %v384_v1  ;;  %v247_v7 = vld.sshfl [vmem:[#allocation5] sm:$0x11 pattern:$0x75316420]  ;;  %vm118_vm0 = vcmask 261120   ;;  %vm139_vm1 = vcmask 1041409  }
  0x28   :  { %v441_v3 = vshrl.u32 %v85_v0, 7  ;;  %v81_v9 = vcombine.high %v247_v7, %v247_v7  ;;  %v248_v17 = vld [vmem:[%s481_s3] ss:$0 sm:$0xff]  ;;  %v130_v24 = vand.u32 127, %v85_v0  ;;  %vm145_vm3 = vcmask 58368  }
  0x29   :  { %v84_v4 = vunpack.c.0.s8 %v83_v2  ;;  %v125_v27 = vld [vmem:[%s482_s4] sm:$0x3] }
  0x2a   :  { %v445_v6 = vsub.s32 0, %v441_v3  ;;  %v133_v26 = vsub.s32 %v130_v24, %v441_v3  ;;  %vm126_vm2 = vcmp.eq.s32.totalorder %v125_v27, 0  ;;  %v157_v41 = vld [vmem:[%s483_s5] sm:$0x3]  ;;  %v189_v59 = vsub.s32 1, %v441_v3  ;;  %s385_s5 = smov [#allocation12]  }
  0x2b   :  { %v87_v5 = vsub.s32 %v84_v4, %v441_v3  ;;  %v166_v49 = vld [vmem:[%s484_s6] sm:$0x3]  ;;  %s233_s6 = sshll.u32 %s385_s5, 4  ;;  %s234_s6 = int_to_ptr.vmem [resolvable:$true] %s233_s6 }
  0x2c   :  { %s331_s25 = scalar_lea.vmem %s234_s6, 32  ;;  %p336_p2 = scmp.lt.s32.totalorder %s234_s6, %s234_s6 }
  0x2d   :  { %v88_v8 = vrot.slane %v247_v7, %v87_v5  ;;  %v95_v12 = vrot.slane %v81_v9, %v87_v5  ;;  %p332_p1 = scmp.ne.s32.totalorder %s234_s6, %s331_s25  ;;  %p337_p3 = scmp.lt.s32.totalorder %s331_s25, %s331_s25 }
  0x2f   :  { %v99_v11 = vrot.slane %v88_v8, %v445_v6  ;;  %v103_v15 = vrot.slane %v95_v12, %v445_v6  ;;  %p338_p4 = por %p337_p3, %p336_p2 }
  0x31   :  { %v106_v14 = vadd.f32 %v99_v11, %v70_v10  ;;  %v107_v16 = vadd.f32 %v103_v15, %v71_v13  ;;  %p339_p5 = pnand %p338_p4, %p332_p1 }
  0x33   :  { %257 = vtanh.f32 %v106_v14 }
  0x34   :  { %259 = vtanh.f32 %v107_v16 }
  0x40   :  { %v258_v18 = vpop.eup %257 }
  0x41   :  { %v116_v19 = vmul.f32 %v258_v18, %v248_v17  ;;  %v260_v20 = vpop.eup %259 }
  0x42   :  { %v117_v22 = vmul.f32 %v260_v20, %v248_v17 }
  0x43   :  { %v119_v21 = vsel %vm118_vm0, %v116_v19, 0.0 }
  0x44   :  { %120 = vadd.xlane.f32.xlu0 %v119_v21  ;;  %v122_v23 = vsel %vm118_vm0, %v117_v22, 0.0 }
  0x48   :  { %123 = vadd.xlane.f32.xlu0 %v122_v23 }
  0xcd   :  { %v121_v25 = vpop.xlane.xlu0 %120 }
  0xce   :  { %v134_v29 = vrot.slane %v121_v25, %v133_v26 }
  0xd1   :  { %v124_v28 = vpop.xlane.xlu0 %123 }
  0xd2   :  { %v138_v30 = vrot.slane %v124_v28, %v133_v26 }
  0xd4   :  { %v140_v31 = vsel %vm139_vm1, %v138_v30, %v134_v29 }
  0xd5   :  { %v142_v32 = vsel %vm126_vm2, -inf, %v140_v31 }
  0xd6   :  { %v146_v33 = vsel %vm145_vm3, %v142_v32, -inf }
  0xd7   :  { %147 = vmax.xlane.f32.xlu1 %v146_v33 }
 0x160   :  { %v148_v34 = vpop.xlane.xlu1 %147 }
 0x161   :  { %v149_v35 = vsub.f32 %v142_v32, %v148_v34 }
 0x163   :  { %v150_v36 = vmul.f32 1.442695, %v149_v35 }
 0x165   :  { %261 = vpow2.f32 %v150_v36 }
 0x172   :  { %v262_v37 = vpop.eup %261 }
 0x173   :  { %v152_v38 = vsel %vm145_vm3, %v262_v37, 0.0 }
 0x174   :  { %153 = vadd.xlane.f32.xlu1 %v152_v38 }
 0x1fd   :  { %v154_v39 = vpop.xlane.xlu1 %153 }
 0x1fe   :  { %263 = vrcp.f32 %v154_v39 }
 0x20b   :  { %v264_v40 = vpop.eup %263 }
 0x20c   :  { %v156_v42 = vmul.f32 %v264_v40, %v262_v37 }
 0x20e   :  { %v158_v43 = vadd.f32 %v157_v41, %v156_v42 }
 0x210   :  { %v159_v44 = vand.u32 2147483647, %v158_v43 }
 0x212   :  { %v160_v45 = vsel %vm145_vm3, %v159_v44, 0.0 }
 0x213   :  { %161 = vadd.xlane.f32.xlu0 %v160_v45 }
 0x29c   :  { %v162_v46 = vpop.xlane.xlu0 %161 }
 0x29d   :  { %v163_v47 = vmax.f32 %v162_v46, 1e-12 }
 0x29f   :  { %265 = vrcp.f32 %v163_v47 }
 0x2ac   :  { %v266_v48 = vpop.eup %265 }
 0x2ad   :  { %v165_v50 = vmul.f32 %v266_v48, %v158_v43 }
 0x2af   :  { %v167_v51 = vadd.f32 %v166_v49, %v165_v50 }
 0x2b1   :  { %v168_v52 = vsel %vm145_vm3, %v167_v51, -inf }
 0x2b2   :  { %169 = vmax.xlane.f32.xlu1 %v168_v52 }
 0x33b   :  { %v170_v53 = vpop.xlane.xlu1 %169 }
 0x33c   :  { %v171_v54 = vsub.f32 %v167_v51, %v170_v53 }
 0x33e   :  { %v172_v55 = vmul.f32 1.442695, %v171_v54 }
 0x340   :  { %267 = vpow2.f32 %v172_v55 }
 0x34d   :  { %v268_v56 = vpop.eup %267 }
 0x34e   :  { %v174_v57 = vsel %vm145_vm3, %v268_v56, 0.0 }
 0x34f   :  { %175 = vadd.xlane.f32.xlu0 %v174_v57 }
 0x3d8   :  { %v176_v58 = vpop.xlane.xlu0 %175 }
 0x3d9   :  { %269 = vrcp.f32 %v176_v58 }
 0x3e6   :  { %v270_v60 = vpop.eup %269 }
 0x3e7   :  { %v178_v61 = vmul.f32 %v270_v60, %v268_v56 }
 0x3e9   :  { %v190_v62 = vrot.slane %v178_v61, %v189_v59  ;;  %179 = vst.msk [vmem:[#allocation12] sm:$0x3] %vm145_vm3, %v178_v61  ;;  %v183_v63 = vrot.slane %v178_v61, %v445_v6 }
 0x3eb   :  { %192 = vbcast.lane.b32.xlu0 %v190_v62, 256  ;;  %185 = vbcast.lane.b32.xlu1 %v183_v63, 256 }
 0x3ec   :  { %342 = shalt.err (!%p339_p5)
}
 0x3ed   :  { %236 = dma.vmem_to_hbm [thread:$0]  %s234_s6, 32, %s486_s8, [#allocation13]   ;;  %v144_v0 = vld [vmem:[#allocation10 + $0x8] sm:$0xff]  ;;  %v143_v1 = vld [vmem:[#allocation10] sm:$0xff]  ;;  %vm196_vm4 = vcmask 130048   ;;  %vm215_vm5 = vcmask 123904  }
 0x3ee   :  { %s386_s8 = smov [#allocation11]  }
 0x3ef   :  { %s223_s28 = sshll.u32 %s386_s8, 4  ;;  %s224_s28 = int_to_ptr.vmem [resolvable:$true] %s223_s28 }
 0x3f0   :  { %s351_s29 = scalar_lea.vmem %s224_s28, 32  ;;  %p356_p7 = scmp.lt.s32.totalorder %s224_s28, %s224_s28 }
 0x3f1   :  { %p352_p6 = scmp.ne.s32.totalorder %s224_s28, %s351_s29  ;;  %p357_p8 = scmp.lt.s32.totalorder %s351_s29, %s351_s29 }
 0x3f3   :  { %p358_p9 = por %p357_p8, %p356_p7 }
 0x3f5   :  { %p359_p10 = pnand %p358_p9, %p352_p6 }
 0x45d   :  { %v193_v2 = vpop.permute.xlu0 %192  ;;  %v186_v3 = vpop.permute.xlu1 %185 }
 0x45e   :  { %v195_v4 = vmul.f32 %v193_v2, %v144_v0  ;;  %v194_v5 = vmul.f32 %v186_v3, %v143_v1 }
 0x460   :  { %v204_v6 = vsel %vm196_vm4, %v195_v4, 0.0  ;;  %v197_v7 = vsel %vm196_vm4, %v194_v5, 0.0 }
 0x461   :  { %v205_v8 = vrot.slane %v204_v6, 4  ;;  %v198_v9 = vrot.slane %v197_v7, 4 }
 0x463   :  { %v206_v10 = vadd.f32 %v205_v8, %v204_v6  ;;  %v199_v11 = vadd.f32 %v198_v9, %v197_v7 }
 0x465   :  { %v207_v12 = vrot.slane %v206_v10, 2  ;;  %v200_v13 = vrot.slane %v199_v11, 2 }
 0x467   :  { %v208_v14 = vadd.f32 %v207_v12, %v206_v10  ;;  %v201_v15 = vadd.f32 %v200_v13, %v199_v11 }
 0x469   :  { %v209_v16 = vrot.slane %v208_v14, 1  ;;  %v202_v17 = vrot.slane %v201_v15, 1 }
 0x46b   :  { %v210_v18 = vadd.f32 %v209_v16, %v208_v14  ;;  %v203_v19 = vadd.f32 %v202_v17, %v201_v15 }
 0x46d   :  { %v213_v20 = vsel %vm139_vm1, %v210_v18, %v203_v19 }
 0x46e   :  { %216 = vst.msk [vmem:[#allocation11] sm:$0x3] %vm215_vm5, %v213_v20 }
 0x46f   :  { %362 = shalt.err (!%p359_p10)
}
 0x470   :  { %226 = dma.vmem_to_hbm [thread:$0]  %s224_s28, 32, %s485_s7, [#allocation7]  }
 0x471   :  { %375 = dma.done.wait [#allocation7], 32  }
 0x472   :  { %376 = vsyncadd [#allocation7], 4294967264 }
 0x473   :  { %377 = dma.done.wait [#allocation13], 32  }
 0x474   :  { %378 = vsyncadd [#allocation13], 4294967264 }
 0x475   :  { %243 = vsyncpa [#allocation6], 1 }
 0x476   :  { %244 = vsyncpa [#allocation9], 1 }
 0x477   :  { %245 = vsyncpa [#allocation7], 1 }
 0x478   :  { %246 = vsyncpa [#allocation13], 1 }

</bundles_post_ra>
